<compile_context>
chip_gen: v7x
topology: tpu7x:2x2x1
jax: 0.10.0
libtpu: 0.0.40
codegen_flags: <defaults>
</compile_context>

<pallas_src>
import jax
import jax.numpy as jnp
from jax.experimental import pallas as pl
from jax.experimental.pallas import tpu as pltpu


def _final_layer_kernel(x_ref, shift_ref, scale_ref, w_ref, b_ref, out_ref):
    # x_ref: (tT, H) activation tile (batch dim squeezed by BlockSpec).
    x = x_ref[...].astype(jnp.float32)

    # ---- two-pass LayerNorm (no affine, eps=1e-6), f32 ----
    mean = jnp.mean(x, axis=-1, keepdims=True)
    xc = x - mean
    var = jnp.mean(xc * xc, axis=-1, keepdims=True)
    xn = xc * jax.lax.rsqrt(var + 1e-6)

    # ---- adaLN modulate (shift/scale are precomputed per-batch, f32) ----
    shift = shift_ref[...].astype(jnp.float32)          # (1, H)
    scale = scale_ref[...].astype(jnp.float32)          # (1, H)
    y = xn * (1.0 + scale) + shift                      # (tT, H)

    # ---- final linear: operands in the weight's dtype, f32 accumulation ----
    y = y.astype(w_ref.dtype)
    out = jnp.dot(y, w_ref[...], preferred_element_type=jnp.float32)
    out = out + b_ref[...].astype(jnp.float32)          # (1, C) bias broadcast
    out_ref[...] = out.astype(out_ref.dtype)


def _vmem_limit_bytes():
    """~75% of physical per-core VMEM (48 MiB on v7x, 96 MiB on v5e/v6e)."""
    try:
        cap = int(pltpu.get_tpu_info().vmem_capacity_bytes)
    except Exception:
        cap = 64 * 1024 * 1024       # conservative fallback (v7x per-TC physical)
    return min((cap * 3) // 4, 96 * 1024 * 1024)


def _pick_seq_tile(T, H, C, in_item, out_item, vmem_limit, *, max_tile=1024):
    """Largest sequence tile (<= max_tile) whose working set fits the budget."""
    # Packed-layout granule: 8 rows for f32, 16 for bf16, 32 for 8-bit dtypes.
    granule = max(8, 32 // max(in_item, 1))
    # Per-row VMEM cost: double-buffered x/out tiles + ~4x H of f32 temporaries
    # (x upcast, centered, normalized, modulated) + f32 matmul result.
    per_row = 2 * H * in_item + 2 * C * out_item + 4 * H * 4 + 2 * C * 4
    # Leave headroom for resident weight/bias, semaphores, compiler scratch.
    budget = max(vmem_limit - (12 << 20), 4 << 20)
    fit = max(granule, int(budget // per_row))
    cap = min(max_tile, fit)
    if T <= cap:
        return T                      # one full-extent block along T (always legal)
    tile = cap - cap % granule
    return max(tile, granule)


def final_layer(x, c, w_mod, b_mod, w_lin, b_lin, *,
                seq_length, out_channels, mxu_dtype=None):
    """x: (B, T, H), c: (B, H). Weights stored transposed (in, out); biases (1, out).

    mxu_dtype: dtype of the MXU operands for the final linear (f32 accumulation
    regardless). Pass jnp.bfloat16 on v5e/v7x when activations are f32 so the
    matmul cadence does not become the bottleneck; default = activation dtype.
    """
    B, T, H = x.shape
    C = w_lin.shape[1]
    assert C == out_channels
    out_dtype = x.dtype
    mxu_dtype = jnp.dtype(mxu_dtype) if mxu_dtype is not None else jnp.dtype(x.dtype)

    # adaLN modulation hoisted out of the kernel (tiny M=1 matmul, MXU-hostile).
    # shift/scale stay in f32: only B*H elements, avoids an extra rounding step.
    c32 = c.astype(jnp.float32)
    mod = (c32 * jax.nn.sigmoid(c32)) @ w_mod.astype(jnp.float32) \
        + b_mod.astype(jnp.float32)
    shift = mod[:, None, :H]                              # (B, 1, H) f32
    scale = mod[:, None, H:]                              # (B, 1, H) f32

    w_used = w_lin.astype(mxu_dtype)                      # (H, C), resident in VMEM
    b_used = b_lin.astype(jnp.float32).reshape(1, C)      # (1, C)

    in_item = jnp.dtype(x.dtype).itemsize
    out_item = jnp.dtype(out_dtype).itemsize
    vmem_limit = _vmem_limit_bytes()
    tT = _pick_seq_tile(T, H, C, in_item, out_item, vmem_limit)
    n_t = pl.cdiv(T, tT)

    cost = pl.CostEstimate(
        flops=2 * B * T * H * C + 10 * B * T * H,
        transcendentals=B * T,                            # one rsqrt per row
        bytes_accessed=(B * T * H * in_item               # x read
                        + B * T * C * out_item            # out write (unpadded)
                        + H * C * jnp.dtype(w_used.dtype).itemsize
                        + C * 4
                        + 2 * B * H * 4),                 # shift/scale (f32)
    )

    out = pl.pallas_call(
        _final_layer_kernel,
        out_shape=jax.ShapeDtypeStruct((B, T, C), out_dtype),
        grid=(B, n_t),
        in_specs=[
            # x tile: batch squeezed, (tT, H) in the kernel.
            pl.BlockSpec((pl.Squeezed(), tT, H), lambda b, t: (b, t, 0)),
            # shift / scale: (1, H) per-batch vectors.
            pl.BlockSpec((pl.Squeezed(), 1, H), lambda b, t: (b, 0, 0)),
            pl.BlockSpec((pl.Squeezed(), 1, H), lambda b, t: (b, 0, 0)),
            # Resident weight / bias: constant block index -> single-buffered.
            pl.BlockSpec((H, C), lambda b, t: (0, 0),
                         pipeline_mode=pl.Buffered(1)),
            pl.BlockSpec((1, C), lambda b, t: (0, 0),
                         pipeline_mode=pl.Buffered(1)),
        ],
        out_specs=pl.BlockSpec((pl.Squeezed(), tT, C), lambda b, t: (b, t, 0)),
        compiler_params=pltpu.CompilerParams(
            dimension_semantics=("parallel", "parallel"),
            vmem_limit_bytes=vmem_limit,
        ),
        cost_estimate=cost,
    )(x, shift, scale, w_used, b_used)

    # Equivalent of torch's .view(-1, seq_length, out_channels); this is a
    # metadata-only reshape of a contiguous buffer (no extra HBM pass).
    return out.reshape(-1, seq_length, out_channels)


if __name__ == "__main__":
    # Small shapes consistent with the module.
    B = 2
    hidden_size = 32
    seq_length = 8
    out_channels = 4
    patch_size = 2  # stored by the torch module but unused in forward

    key = jax.random.PRNGKey(0)
    kx, kc, k1, k2, k3, k4 = jax.random.split(key, 6)

    x = jax.random.normal(kx, (B, seq_length, hidden_size), dtype=jnp.float32)
    c = jax.random.normal(kc, (B, hidden_size), dtype=jnp.float32)

    # PyTorch Linear weight is (out, in); we store transposed (in, out).
    w_mod = 0.02 * jax.random.normal(k1, (hidden_size, 2 * hidden_size), dtype=jnp.float32)
    b_mod = 0.01 * jax.random.normal(k2, (1, 2 * hidden_size), dtype=jnp.float32)
    w_lin = 0.02 * jax.random.normal(k3, (hidden_size, out_channels), dtype=jnp.float32)
    b_lin = 0.01 * jax.random.normal(k4, (1, out_channels), dtype=jnp.float32)

    out = final_layer(x, c, w_mod, b_mod, w_lin, b_lin,
                      seq_length=seq_length, out_channels=out_channels)
    jax.block_until_ready(out)

    # Pure-JAX reference check.
    silu = lambda v: v * jax.nn.sigmoid(v)
    mod = silu(c) @ w_mod + b_mod
    shift_ref, scale_ref = mod[:, :hidden_size], mod[:, hidden_size:]
    mean = x.mean(-1, keepdims=True)
    var = ((x - mean) ** 2).mean(-1, keepdims=True)
    xn = (x - mean) / jnp.sqrt(var + 1e-6)
    y = xn * (1 + scale_ref[:, None, :]) + shift_ref[:, None, :]
    ref = (y @ w_lin + b_lin).reshape(-1, seq_length, out_channels)

    assert out.shape == (B, seq_length, out_channels)
    assert jnp.allclose(out, ref, atol=2e-5, rtol=1e-5)

    # bf16-MXU path (recommended for f32 activations on v5e / v7x): same
    # semantics, f32 accumulation, looser tolerance due to bf16 operands.
    out_bf16 = final_layer(x, c, w_mod, b_mod, w_lin, b_lin,
                           seq_length=seq_length, out_channels=out_channels,
                           mxu_dtype=jnp.bfloat16)
    jax.block_until_ready(out_bf16)
    assert out_bf16.shape == (B, seq_length, out_channels)
    assert jnp.allclose(out_bf16, ref, atol=1e-2, rtol=5e-2)

    print("KERNEL_OK")
</pallas_src>

<mosaic_0001>
module attributes {stable_mosaic.version = 11 : i64} {
  func.func @_final_layer_kernel(%arg0: i32, %arg1: i32, %arg2: memref<1x8x32xf32, #tpu.memory_space<vmem>>, %arg3: memref<1x1x32xf32, #tpu.memory_space<vmem>>, %arg4: memref<1x1x32xf32, #tpu.memory_space<vmem>>, %arg5: memref<32x4xf32, #tpu.memory_space<vmem>>, %arg6: memref<1x4xf32, #tpu.memory_space<vmem>>, %arg7: memref<1x8x4xf32, #tpu.memory_space<vmem>>) attributes {dimension_semantics = [#tpu.dimension_semantics<parallel>, #tpu.dimension_semantics<parallel>], iteration_bounds = array<i64: 2, 1>, scalar_prefetch = 0 : i64, scratch_operands = 0 : i64, tpu.core_type = #tpu.core_type<tc>, window_params = [{transform_indices = @transform_0, window_bounds = array<i64: 1, 8, 32>}, {transform_indices = @transform_1, window_bounds = array<i64: 1, 1, 32>}, {transform_indices = @transform_2, window_bounds = array<i64: 1, 1, 32>}, {pipeline_mode = #tpu.pipeline_mode<synchronous>, transform_indices = @transform_3, window_bounds = array<i64: 32, 4>}, {pipeline_mode = #tpu.pipeline_mode<synchronous>, transform_indices = @transform_4, window_bounds = array<i64: 1, 4>}, {transform_indices = @transform_5, window_bounds = array<i64: 1, 8, 4>}]} {
    %c0 = arith.constant 0 : index
    %c0_0 = arith.constant 0 : index
    %c0_1 = arith.constant 0 : index
    %0 = vector.load %arg2[%c0, %c0_0, %c0_1] : memref<1x8x32xf32, #tpu.memory_space<vmem>>, vector<1x8x32xf32>
    %1 = vector.shape_cast %0 : vector<1x8x32xf32> to vector<8x32xf32>
    %cst = arith.constant dense<0.000000e+00> : vector<8xf32>
    %2 = vector.multi_reduction <add>, %1, %cst [1] : vector<8x32xf32> to vector<8xf32>
    %3 = vector.shape_cast %2 : vector<8xf32> to vector<8x1xf32>
    %cst_2 = arith.constant 3.200000e+01 : f32
    %4 = vector.broadcast %cst_2 : f32 to vector<8x1xf32>
    %5 = arith.divf %3, %4 : vector<8x1xf32>
    %6 = vector.broadcast %5 : vector<8x1xf32> to vector<8x32xf32>
    %7 = arith.subf %1, %6 : vector<8x32xf32>
    %8 = arith.mulf %7, %7 : vector<8x32xf32>
    %cst_3 = arith.constant dense<0.000000e+00> : vector<8xf32>
    %9 = vector.multi_reduction <add>, %8, %cst_3 [1] : vector<8x32xf32> to vector<8xf32>
    %10 = vector.shape_cast %9 : vector<8xf32> to vector<8x1xf32>
    %cst_4 = arith.constant 3.200000e+01 : f32
    %11 = vector.broadcast %cst_4 : f32 to vector<8x1xf32>
    %12 = arith.divf %10, %11 : vector<8x1xf32>
    %cst_5 = arith.constant 9.99999997E-7 : f32
    %13 = vector.broadcast %cst_5 : f32 to vector<8x1xf32>
    %14 = arith.addf %12, %13 : vector<8x1xf32>
    %15 = math.rsqrt %14 : vector<8x1xf32>
    %16 = vector.broadcast %15 : vector<8x1xf32> to vector<8x32xf32>
    %17 = arith.mulf %7, %16 : vector<8x32xf32>
    %c0_6 = arith.constant 0 : index
    %c0_7 = arith.constant 0 : index
    %c0_8 = arith.constant 0 : index
    %18 = vector.load %arg3[%c0_6, %c0_7, %c0_8] : memref<1x1x32xf32, #tpu.memory_space<vmem>>, vector<1x1x32xf32>
    %19 = vector.shape_cast %18 : vector<1x1x32xf32> to vector<1x32xf32>
    %c0_9 = arith.constant 0 : index
    %c0_10 = arith.constant 0 : index
    %c0_11 = arith.constant 0 : index
    %20 = vector.load %arg4[%c0_9, %c0_10, %c0_11] : memref<1x1x32xf32, #tpu.memory_space<vmem>>, vector<1x1x32xf32>
    %21 = vector.shape_cast %20 : vector<1x1x32xf32> to vector<1x32xf32>
    %cst_12 = arith.constant 1.000000e+00 : f32
    %22 = vector.broadcast %cst_12 : f32 to vector<1x32xf32>
    %23 = arith.addf %22, %21 : vector<1x32xf32>
    %24 = vector.broadcast %23 : vector<1x32xf32> to vector<8x32xf32>
    %25 = arith.mulf %17, %24 : vector<8x32xf32>
    %26 = vector.broadcast %19 : vector<1x32xf32> to vector<8x32xf32>
    %27 = arith.addf %25, %26 : vector<8x32xf32>
    %c0_13 = arith.constant 0 : index
    %c0_14 = arith.constant 0 : index
    %28 = vector.load %arg5[%c0_13, %c0_14] : memref<32x4xf32, #tpu.memory_space<vmem>>, vector<32x4xf32>
    %cst_15 = arith.constant dense<0.000000e+00> : vector<8x4xf32>
    %29 = tpu.matmul %27, %28, %cst_15 {dimension_numbers = #tpu.dot_dimension_numbers<[1], [0], [0], [1], [0, 0, 1, 1], [], []>} : vector<8x32xf32>, vector<32x4xf32>, vector<8x4xf32> -> vector<8x4xf32>
    %c0_16 = arith.constant 0 : index
    %c0_17 = arith.constant 0 : index
    %30 = vector.load %arg6[%c0_16, %c0_17] : memref<1x4xf32, #tpu.memory_space<vmem>>, vector<1x4xf32>
    %31 = vector.broadcast %30 : vector<1x4xf32> to vector<8x4xf32>
    %32 = arith.addf %29, %31 : vector<8x4xf32>
    %c0_18 = arith.constant 0 : index
    %c0_19 = arith.constant 0 : index
    %c0_20 = arith.constant 0 : index
    %33 = vector.load %arg7[%c0_18, %c0_19, %c0_20] : memref<1x8x4xf32, #tpu.memory_space<vmem>>, vector<1x8x4xf32>
    %34 = vector.shape_cast %33 : vector<1x8x4xf32> to vector<8x4xf32>
    %35 = vector.shape_cast %32 : vector<8x4xf32> to vector<1x8x4xf32>
    tpu.vector_store %arg7[%c0_18, %c0_19, %c0_20], %35 {strides = array<i32>} : memref<1x8x4xf32, #tpu.memory_space<vmem>>, vector<1x8x4xf32>,
    return
  }
  func.func @transform_0(%arg0: i32, %arg1: i32) -> (i32, i32, i32) {
    %c0_i32 = arith.constant 0 : i32
    %c0_i32_0 = arith.constant 0 : i32
    return %arg0, %arg1, %c0_i32 : i32, i32, i32
  }
  func.func @transform_1(%arg0: i32, %arg1: i32) -> (i32, i32, i32) {
    %c0_i32 = arith.constant 0 : i32
    %c0_i32_0 = arith.constant 0 : i32
    %c0_i32_1 = arith.constant 0 : i32
    return %arg0, %c0_i32, %c0_i32_0 : i32, i32, i32
  }
  func.func @transform_2(%arg0: i32, %arg1: i32) -> (i32, i32, i32) {
    %c0_i32 = arith.constant 0 : i32
    %c0_i32_0 = arith.constant 0 : i32
    %c0_i32_1 = arith.constant 0 : i32
    return %arg0, %c0_i32, %c0_i32_0 : i32, i32, i32
  }
  func.func @transform_3(%arg0: i32, %arg1: i32) -> (i32, i32) {
    %c0_i32 = arith.constant 0 : i32
    %c0_i32_0 = arith.constant 0 : i32
    %c0_i32_1 = arith.constant 0 : i32
    return %c0_i32, %c0_i32_0 : i32, i32
  }
  func.func @transform_4(%arg0: i32, %arg1: i32) -> (i32, i32) {
    %c0_i32 = arith.constant 0 : i32
    %c0_i32_0 = arith.constant 0 : i32
    %c0_i32_1 = arith.constant 0 : i32
    return %c0_i32, %c0_i32_0 : i32, i32
  }
  func.func @transform_5(%arg0: i32, %arg1: i32) -> (i32, i32, i32) {
    %c0_i32 = arith.constant 0 : i32
    %c0_i32_0 = arith.constant 0 : i32
    return %arg0, %arg1, %c0_i32 : i32, i32, i32
  }
}

</mosaic_0001>

<bundles_post_ra>
// kernel: tpu_custom_call.1
= control target key start
LH: loop header
LB: loop body
LE: loop exit
PB: predicated region body
PF: predicated region fallthrough
CT: control target
= control target key end

     0   :  { %s610_s18 = smov 0   ;;  %s612_s19 = smov 0   ;;  %s676_s0 = inlined_call_operand.vmem [shape: f32[2,8,32], index: 0, kind: input, shape index: {}]   ;;  %s677_s1 = inlined_call_operand.vmem [shape: f32[2,1,32], index: 1, kind: input, shape index: {}]   ;;  %s678_s2 = inlined_call_operand.vmem [shape: f32[2,1,32], index: 2, kind: input, shape index: {}]   ;;  %s679_s3 = inlined_call_operand.vmem [shape: f32[32,4], index: 3, kind: input, shape index: {}]   ;;  %s680_s4 = inlined_call_operand.vmem [shape: f32[1,4], index: 4, kind: input, shape index: {}]   ;;  %s681_s5 = inlined_call_operand.vmem [shape: f32[2,8,4], index: 5, kind: output, shape index: {}]  }
   0x1   :  { %s614_s20 = smov 0  }
   0x2 LB: > { %s27_s21 = sadd.s32 1, %s571_s19  ;;  %p494_p0 = scmp.ge.s32.totalorder %s575_s20, 1  ;;  %s575_s20 = sphi %s614_s20, %s15_s20   ;;  %s571_s19 = sphi %s612_s19, %s683_s19   ;;  %s567_s18 = sphi %s610_s18, %s682_s18  }
   0x3   : > { %p29_p1 = scmp.ge.s32.totalorder %s27_s21, 2  ;;  %p221_p2 = scmp.lt.s32.totalorder %s575_s20, 3 }
   0x5   : > { %s685_s21 = smov (%p29_p1, %s27_s21), 0  ;;  %p222_p3 = pnand %p494_p0, %p221_p2 }
   0x6   : > { %p259_p4 = scmp.lt.s32.totalorder (!%p222_p3), %s567_s18, 1  ;;  %vm280_vm0 = vcmask (!%p222_p3), 261120   ;;  %v312_v7 = vld [vmem:[%s679_s3] sm:$0xff] (!%p222_p3)  ;;  %v313_v8 = vld [vmem:[%s679_s3 + $0x8] sm:$0xff] (!%p222_p3)  ;;  %v314_v9 = vld [vmem:[%s679_s3 + $0x10] sm:$0xff] (!%p222_p3)  ;;  %v577_v10 = vmov (!%p222_p3), 0.0|0.0   ;;  %v299_v17 = vlaneseq (!%p222_p3) }
   0x7   : > { %225 = sbr.rel (%p222_p3) target bundleno = 546 (0x222), region = 40  ;;  %518 = vmatprep.subr.bf16.mxu0 (!%p222_p3), %v577_v10  ;;  %v519_v11 = vpack.c.bf16 (!%p222_p3), %v313_v8, %v312_v7  ;;  %v315_v12 = vld [vmem:[%s679_s3 + $0x18] sm:$0xff] (!%p222_p3)  ;;  %vm578_vm1 = vmmov (!%p222_p3), 0   ;;  %v579_v13 = vmov (!%p222_p3), 0.0   ;;  %v498_v29 = vld [vmem:[%s680_s4] ss:$0 sm:$0xff] (!%p222_p3) }
   0x8   : > { %515 = vmatprep.mubr.msk.f32.mxu0 (!%p222_p3), %vm578_vm1, %v579_v13  ;;  %v522_v14 = vpack.c.bf16 (!%p222_p3), %v315_v12, %v314_v9  ;;  %v300_v19 = vshrl.u32 (!%p222_p3), %v299_v17, 7  ;;  %vm396_vm2 = vcmask (!%p222_p3), 31744  }
   0x9   : > { %520 = vmatpush3.bf16.msra.mxu0 (!%p222_p3), %v519_v11 }
   0xa   : > { %521 = vmatprep.subr.bf16.mxu0 (!%p222_p3), %v577_v10  ;;  %v301_v22 = vsub.s32 (!%p222_p3), 0, %v300_v19 }
   0xd   : > { %523 = vmatpush3.bf16.msra.mxu0 (!%p222_p3), %v522_v14 }
   0xe   : > { %s687_s18 = smov (!%p259_p4, %s567_s18), 1 }
   0xf   : > { %s495_s22 = sshll.u32 %s687_s18, 3  ;;  %s271_s11 = scalar_lea.vmem %s678_s2, %s687_s18 }
  0x10   : > { %s265_s25 = scalar_lea.vmem %s676_s0, %s495_s22  ;;  %v296_v20 = vld [vmem:[%s271_s11] sm:$0x1]  ;;  %s268_s14 = scalar_lea.vmem %s677_s1, %s687_s18 }
  0x11   : > { %v279_v0 = vld [vmem:[%s265_s25] sm:$0xff]  ;;  %v297_v21 = vadd.f32 1.0, %v296_v20  ;;  %s278_s24 = scalar_lea.vmem %s681_s5, %s495_s22 }
  0x12   : > { %v281_v1 = vsel %vm280_vm0, %v279_v0, 0.0  ;;  %v497_v26 = vld [vmem:[%s268_s14] ss:$0 sm:$0xff] }
  0x13   : > { %282 = vadd.xlane.f32.xlu0 %v281_v1  ;;  %v302_v23 = vrot.slane %v297_v21, %v301_v22 }
  0xa0   : > { %v283_v2 = vpop.xlane.xlu0 %282 }
  0xa1   : > { %v285_v3 = vmul.f32 0.03125, %v283_v2 }
  0xa3   : > { %v286_v4 = vsub.f32 %v279_v0, %v285_v3 }
  0xa5   : > { %v287_v5 = vmul.f32 %v286_v4, %v286_v4 }
  0xa7   : > { %v288_v6 = vsel %vm280_vm0, %v287_v5, 0.0 }
  0xa8   : > { %289 = vadd.xlane.f32.xlu0 %v288_v6 }
 0x135   : > { %v290_v15 = vpop.xlane.xlu0 %289 }
 0x136   : > { %v291_v16 = vmul.f32 0.03125, %v290_v15 }
 0x138   : > { %v292_v18 = vadd.f32 1e-06, %v291_v16 }
 0x13a   : > { %551 = vrsqrt.f32 %v292_v18 }
 0x144   : > { %v552_v24 = vpop.eup %551 }
 0x145   : > { %v294_v25 = vmul.f32 %v552_v24, %v286_v4 }
 0x147   : > { %v304_v27 = vmul.f32 %v302_v23, %v294_v25 }
 0x149   : > { %v311_v28 = vadd.f32 %v497_v26, %v304_v27 }
 0x14b   : > { %516 = vmatmul.mubr.msk.f32.vlgmr.msra.gmra.mrb[0].mxu0 %vm280_vm0, %v311_v28 }
 0x21e   : > { %v392_v30 = vpop.f32.mrb[0].mxu0 }
 0x21f   : > { %v393_v31 = vadd.f32 %v498_v29, %v392_v30  ;;  %v517_v32 = vpop.f32.mrb[1].mxu0 }
 0x221   : > { %397 = vst.msk [vmem:[%s278_s24] sm:$0xff] %vm396_vm2, %v393_v31 }
 0x222 PF: > { %s15_s20 = sadd.s32 1, %s575_s20   ;;  %s682_s18 = smov %s571_s19 }
 0x223   : > { %p12_p5 = scmp.ge.s32.totalorder %s15_s20, 4   ;;  %s683_s19 = smov %s685_s21 }
 0x225   :  { %14 = sbr.rel (!%p12_p5) target bundleno = 2 (0x2), region = 76 }

</bundles_post_ra>
